<compile_context>
chip_gen: v7x
topology: tpu7x:2x2x1
jax: 0.10.0
libtpu: 0.0.40
codegen_flags: <defaults>
</compile_context>

<pallas_src>
import jax
import jax.numpy as jnp
from jax.experimental import pallas as pl
from jax.experimental.pallas import tpu as pltpu


_SQRT_2_OVER_PI = 0.7978845608028654


def _gelu_tanh(x):
    """tanh-approximate GELU (matches torch.nn.GELU(approximate='tanh'))."""
    return 0.5 * x * (1.0 + jnp.tanh(_SQRT_2_OVER_PI * (x + 0.044715 * x * x * x)))


def _round_up(n, m):
    return ((n + m - 1) // m) * m


def mlp_kernel(x_ref, w1_ref, b1_ref, w2_ref, b2_ref, w3_ref, b3_ref, o_ref):
    """Fused 3-layer MLP for one batch-row tile.

    x_ref : (TB, Din)  (f32 or bf16)   w1: (Din, H1) (same dtype as x)
    b1    : (1, H1) f32                w2: (H1, H2) f32    b2: (1, H2) f32
    w3    : (H2, Dout_pad) f32         b3: (1, Dout_pad) f32
    o_ref : (TB, Dout_pad)
    """
    # First matmul: x / w1 may be bf16 (halves dominant HBM read traffic);
    # MXU accumulates in f32 via preferred_element_type either way.
    h1 = jnp.dot(x_ref[...], w1_ref[...], preferred_element_type=jnp.float32)
    h1 = _gelu_tanh(h1 + b1_ref[...].astype(jnp.float32))

    h2 = jnp.dot(h1, w2_ref[...], preferred_element_type=jnp.float32)
    h2 = _gelu_tanh(h2 + b2_ref[...].astype(jnp.float32))

    out = jnp.dot(h2, w3_ref[...], preferred_element_type=jnp.float32)
    out = out + b3_ref[...].astype(jnp.float32)
    o_ref[...] = out.astype(o_ref.dtype)


def _pick_tile_rows(batch, cap):
    """Batch-row tile size.

    - batch <= 8: one block equal to the full (tiny) batch (block dim == array
      dim satisfies the (8,128) rule with no padding at all).
    - otherwise: a multiple of 8, <= batch (so the block never exceeds the
      array), ~half the batch when small so the grid has >= 2 steps (lets the
      'parallel' axis use both v7x TensorCores), capped at `cap` (default 512,
      which already reaches ~85% of HBM roofline on v5e/v6e; raise on v7x).
    """
    if batch <= 8:
        return batch
    floor8 = (batch // 8) * 8
    half = _round_up((batch + 1) // 2, 8)
    return max(8, min(cap, half, floor8))


def mlp_pallas(x, params, *, tile_rows=512, use_bf16_stream=False):
    """x: (B, ...) flattened to (B, Din); params: (w1, b1, w2, b2, w3, b3)."""
    w1, b1, w2, b2, w3, b3 = params
    B = x.shape[0]
    xf = x.reshape(B, -1)
    Din = xf.shape[1]
    Dout = w3.shape[1]
    out_dtype = w3.dtype

    if use_bf16_stream:
        # Halve HBM traffic of the dominant x stream (and w1); MXU takes bf16
        # with f32 accumulation, so only the input quantization changes numerics.
        xf = xf.astype(jnp.bfloat16)
        w1 = w1.astype(jnp.bfloat16)

    # Lane-dense output: pad the tiny last-layer weight/bias to a multiple of
    # 128 columns -> full-width stores instead of masked vst.msk per row.
    Dout_pad = _round_up(Dout, 128)
    if Dout_pad != Dout:
        w3 = jnp.pad(w3, ((0, 0), (0, Dout_pad - Dout)))
        b3 = jnp.pad(b3, ((0, 0), (0, Dout_pad - Dout)))

    TB = _pick_tile_rows(B, tile_rows)
    grid = (pl.cdiv(B, TB),)  # ragged last block handled by Pallas masking; no jnp.pad of x

    def full_spec(a):
        nd = a.ndim
        return pl.BlockSpec(a.shape, lambda i, _nd=nd: (0,) * _nd)

    out = pl.pallas_call(
        mlp_kernel,
        out_shape=jax.ShapeDtypeStruct((B, Dout_pad), out_dtype),
        grid=grid,
        in_specs=[
            pl.BlockSpec((TB, Din), lambda i: (i, 0)),
            full_spec(w1), full_spec(b1),
            full_spec(w2), full_spec(b2),
            full_spec(w3), full_spec(b3),
        ],
        out_specs=pl.BlockSpec((TB, Dout_pad), lambda i: (i, 0)),
        compiler_params=pltpu.CompilerParams(
            dimension_semantics=("parallel",),
            vmem_limit_bytes=32 << 20,   # explicit; safe on all gens, room for bigger tiles
        ),
    )(xf, w1, b1, w2, b2, w3, b3)

    return out[:, :Dout]


def mlp_reference(x, params, *, bf16_stream=False):
    """Plain-JAX reference (eval-mode PyTorch MLP.forward semantics)."""
    w1, b1, w2, b2, w3, b3 = params
    xf = x.reshape(x.shape[0], -1)
    if bf16_stream:
        xf = xf.astype(jnp.bfloat16)
        w1 = w1.astype(jnp.bfloat16)
    h = _gelu_tanh(jnp.dot(xf, w1, preferred_element_type=jnp.float32) + b1[0])
    h = _gelu_tanh(jnp.dot(h, w2, preferred_element_type=jnp.float32) + b2[0])
    return jnp.dot(h, w3, preferred_element_type=jnp.float32) + b3[0]


if __name__ == "__main__":
    # Shapes implied by the module: 4-D image-like input flattened from dim 1.
    B, C, H, W = 2, 4, 16, 16
    input_dim = C * H * W          # 1024 (lane-dense: multiple of 128)
    hidden_dim = 32
    hidden_half = hidden_dim // 2  # 16
    output_dim = 10

    key = jax.random.PRNGKey(0)
    ks = jax.random.split(key, 8)
    x = jax.random.normal(ks[0], (B, C, H, W), jnp.float32)

    # Weights stored as (in_dim, out_dim); biases as (1, out_dim).
    def init_w(k, fan_in, fan_out):
        return jax.random.normal(k, (fan_in, fan_out), jnp.float32) / jnp.sqrt(fan_in)

    w1 = init_w(ks[1], input_dim, hidden_dim)
    b1 = jax.random.normal(ks[2], (1, hidden_dim), jnp.float32) * 0.1
    w2 = init_w(ks[3], hidden_dim, hidden_half)
    b2 = jax.random.normal(ks[4], (1, hidden_half), jnp.float32) * 0.1
    w3 = init_w(ks[5], hidden_half, output_dim)
    b3 = jax.random.normal(ks[6], (1, output_dim), jnp.float32) * 0.1
    params = (w1, b1, w2, b2, w3, b3)

    # 1) Tiny batch (spec shape): single full-batch block.
    out = jax.block_until_ready(mlp_pallas(x, params))
    ref = jax.block_until_ready(mlp_reference(x, params))
    assert out.shape == (B, output_dim), out.shape
    err = float(jnp.max(jnp.abs(out - ref)))
    assert jnp.allclose(out, ref, atol=2e-2, rtol=2e-2), err

    # 2) Larger ragged batch: exercises cdiv grid + masked last block (no jnp.pad of x).
    xb = jax.random.normal(ks[7], (300, C, H, W), jnp.float32)
    outb = jax.block_until_ready(mlp_pallas(xb, params))
    refb = jax.block_until_ready(mlp_reference(xb, params))
    assert outb.shape == (300, output_dim), outb.shape
    errb = float(jnp.max(jnp.abs(outb - refb)))
    assert jnp.allclose(outb, refb, atol=2e-2, rtol=2e-2), errb

    # 3) Optional bf16 x/w1 stream (halves dominant HBM traffic on v5e/v6e).
    outbf = jax.block_until_ready(mlp_pallas(xb, params, use_bf16_stream=True))
    refbf = jax.block_until_ready(mlp_reference(xb, params, bf16_stream=True))
    errbf = float(jnp.max(jnp.abs(outbf - refbf)))
    assert jnp.allclose(outbf, refbf, atol=2e-2, rtol=2e-2), errbf

    print("KERNEL_OK")
</pallas_src>

<mosaic_0001>
module attributes {stable_mosaic.version = 11 : i64} {
  func.func @mlp_kernel(%arg0: i32, %arg1: memref<2x1024xf32, #tpu.memory_space<vmem>>, %arg2: memref<1024x32xf32, #tpu.memory_space<vmem>>, %arg3: memref<1x32xf32, #tpu.memory_space<vmem>>, %arg4: memref<32x16xf32, #tpu.memory_space<vmem>>, %arg5: memref<1x16xf32, #tpu.memory_space<vmem>>, %arg6: memref<16x128xf32, #tpu.memory_space<vmem>>, %arg7: memref<1x128xf32, #tpu.memory_space<vmem>>, %arg8: memref<2x128xf32, #tpu.memory_space<vmem>>) attributes {dimension_semantics = [#tpu.dimension_semantics<parallel>], iteration_bounds = array<i64: 1>, scalar_prefetch = 0 : i64, scratch_operands = 0 : i64, tpu.core_type = #tpu.core_type<tc>, window_params = [{transform_indices = @transform_0, window_bounds = array<i64: 2, 1024>}, {pipeline_mode = #tpu.pipeline_mode<synchronous>, transform_indices = @transform_1, window_bounds = array<i64: 1024, 32>}, {pipeline_mode = #tpu.pipeline_mode<synchronous>, transform_indices = @transform_2, window_bounds = array<i64: 1, 32>}, {pipeline_mode = #tpu.pipeline_mode<synchronous>, transform_indices = @transform_3, window_bounds = array<i64: 32, 16>}, {pipeline_mode = #tpu.pipeline_mode<synchronous>, transform_indices = @transform_4, window_bounds = array<i64: 1, 16>}, {pipeline_mode = #tpu.pipeline_mode<synchronous>, transform_indices = @transform_5, window_bounds = array<i64: 16, 128>}, {pipeline_mode = #tpu.pipeline_mode<synchronous>, transform_indices = @transform_6, window_bounds = array<i64: 1, 128>}, {transform_indices = @transform_7, window_bounds = array<i64: 2, 128>}]} {
    %c0 = arith.constant 0 : index
    %c0_0 = arith.constant 0 : index
    %0 = vector.load %arg1[%c0, %c0_0] : memref<2x1024xf32, #tpu.memory_space<vmem>>, vector<2x1024xf32>
    %c0_1 = arith.constant 0 : index
    %c0_2 = arith.constant 0 : index
    %1 = vector.load %arg2[%c0_1, %c0_2] : memref<1024x32xf32, #tpu.memory_space<vmem>>, vector<1024x32xf32>
    %cst = arith.constant dense<0.000000e+00> : vector<2x32xf32>
    %2 = tpu.matmul %0, %1, %cst {dimension_numbers = #tpu.dot_dimension_numbers<[1], [0], [0], [1], [0, 0, 1, 1], [], []>} : vector<2x1024xf32>, vector<1024x32xf32>, vector<2x32xf32> -> vector<2x32xf32>
    %c0_3 = arith.constant 0 : index
    %c0_4 = arith.constant 0 : index
    %3 = vector.load %arg3[%c0_3, %c0_4] : memref<1x32xf32, #tpu.memory_space<vmem>>, vector<1x32xf32>
    %4 = vector.broadcast %3 : vector<1x32xf32> to vector<2x32xf32>
    %5 = arith.addf %2, %4 : vector<2x32xf32>
    %cst_5 = arith.constant 5.000000e-01 : f32
    %6 = vector.broadcast %cst_5 : f32 to vector<2x32xf32>
    %7 = arith.mulf %6, %5 : vector<2x32xf32>
    %cst_6 = arith.constant 4.471500e-02 : f32
    %8 = vector.broadcast %cst_6 : f32 to vector<2x32xf32>
    %9 = arith.mulf %8, %5 : vector<2x32xf32>
    %10 = arith.mulf %9, %5 : vector<2x32xf32>
    %11 = arith.mulf %10, %5 : vector<2x32xf32>
    %12 = arith.addf %5, %11 : vector<2x32xf32>
    %cst_7 = arith.constant 0.797884583 : f32
    %13 = vector.broadcast %cst_7 : f32 to vector<2x32xf32>
    %14 = arith.mulf %13, %12 : vector<2x32xf32>
    %15 = math.tanh %14 : vector<2x32xf32>
    %cst_8 = arith.constant 1.000000e+00 : f32
    %16 = vector.broadcast %cst_8 : f32 to vector<2x32xf32>
    %17 = arith.addf %16, %15 : vector<2x32xf32>
    %18 = arith.mulf %7, %17 : vector<2x32xf32>
    %c0_9 = arith.constant 0 : index
    %c0_10 = arith.constant 0 : index
    %19 = vector.load %arg4[%c0_9, %c0_10] : memref<32x16xf32, #tpu.memory_space<vmem>>, vector<32x16xf32>
    %cst_11 = arith.constant dense<0.000000e+00> : vector<2x16xf32>
    %20 = tpu.matmul %18, %19, %cst_11 {dimension_numbers = #tpu.dot_dimension_numbers<[1], [0], [0], [1], [0, 0, 1, 1], [], []>} : vector<2x32xf32>, vector<32x16xf32>, vector<2x16xf32> -> vector<2x16xf32>
    %c0_12 = arith.constant 0 : index
    %c0_13 = arith.constant 0 : index
    %21 = vector.load %arg5[%c0_12, %c0_13] : memref<1x16xf32, #tpu.memory_space<vmem>>, vector<1x16xf32>
    %22 = vector.broadcast %21 : vector<1x16xf32> to vector<2x16xf32>
    %23 = arith.addf %20, %22 : vector<2x16xf32>
    %cst_14 = arith.constant 5.000000e-01 : f32
    %24 = vector.broadcast %cst_14 : f32 to vector<2x16xf32>
    %25 = arith.mulf %24, %23 : vector<2x16xf32>
    %cst_15 = arith.constant 4.471500e-02 : f32
    %26 = vector.broadcast %cst_15 : f32 to vector<2x16xf32>
    %27 = arith.mulf %26, %23 : vector<2x16xf32>
    %28 = arith.mulf %27, %23 : vector<2x16xf32>
    %29 = arith.mulf %28, %23 : vector<2x16xf32>
    %30 = arith.addf %23, %29 : vector<2x16xf32>
    %cst_16 = arith.constant 0.797884583 : f32
    %31 = vector.broadcast %cst_16 : f32 to vector<2x16xf32>
    %32 = arith.mulf %31, %30 : vector<2x16xf32>
    %33 = math.tanh %32 : vector<2x16xf32>
    %cst_17 = arith.constant 1.000000e+00 : f32
    %34 = vector.broadcast %cst_17 : f32 to vector<2x16xf32>
    %35 = arith.addf %34, %33 : vector<2x16xf32>
    %36 = arith.mulf %25, %35 : vector<2x16xf32>
    %c0_18 = arith.constant 0 : index
    %c0_19 = arith.constant 0 : index
    %37 = vector.load %arg6[%c0_18, %c0_19] : memref<16x128xf32, #tpu.memory_space<vmem>>, vector<16x128xf32>
    %cst_20 = arith.constant dense<0.000000e+00> : vector<2x128xf32>
    %38 = tpu.matmul %36, %37, %cst_20 {dimension_numbers = #tpu.dot_dimension_numbers<[1], [0], [0], [1], [0, 0, 1, 1], [], []>} : vector<2x16xf32>, vector<16x128xf32>, vector<2x128xf32> -> vector<2x128xf32>
    %c0_21 = arith.constant 0 : index
    %c0_22 = arith.constant 0 : index
    %39 = vector.load %arg7[%c0_21, %c0_22] : memref<1x128xf32, #tpu.memory_space<vmem>>, vector<1x128xf32>
    %40 = vector.broadcast %39 : vector<1x128xf32> to vector<2x128xf32>
    %41 = arith.addf %38, %40 : vector<2x128xf32>
    %c0_23 = arith.constant 0 : index
    %c0_24 = arith.constant 0 : index
    %42 = vector.load %arg8[%c0_23, %c0_24] : memref<2x128xf32, #tpu.memory_space<vmem>>, vector<2x128xf32>
    tpu.vector_store %arg8[%c0_23, %c0_24], %41 {strides = array<i32>} : memref<2x128xf32, #tpu.memory_space<vmem>>, vector<2x128xf32>,
    return
  }
  func.func @transform_0(%arg0: i32) -> (i32, i32) {
    %c0_i32 = arith.constant 0 : i32
    %c0_i32_0 = arith.constant 0 : i32
    return %arg0, %c0_i32 : i32, i32
  }
  func.func @transform_1(%arg0: i32) -> (i32, i32) {
    %c0_i32 = arith.constant 0 : i32
    %c0_i32_0 = arith.constant 0 : i32
    %c0_i32_1 = arith.constant 0 : i32
    return %c0_i32, %c0_i32_0 : i32, i32
  }
  func.func @transform_2(%arg0: i32) -> (i32, i32) {
    %c0_i32 = arith.constant 0 : i32
    %c0_i32_0 = arith.constant 0 : i32
    %c0_i32_1 = arith.constant 0 : i32
    return %c0_i32, %c0_i32_0 : i32, i32
  }
  func.func @transform_3(%arg0: i32) -> (i32, i32) {
    %c0_i32 = arith.constant 0 : i32
    %c0_i32_0 = arith.constant 0 : i32
    %c0_i32_1 = arith.constant 0 : i32
    return %c0_i32, %c0_i32_0 : i32, i32
  }
  func.func @transform_4(%arg0: i32) -> (i32, i32) {
    %c0_i32 = arith.constant 0 : i32
    %c0_i32_0 = arith.constant 0 : i32
    %c0_i32_1 = arith.constant 0 : i32
    return %c0_i32, %c0_i32_0 : i32, i32
  }
  func.func @transform_5(%arg0: i32) -> (i32, i32) {
    %c0_i32 = arith.constant 0 : i32
    %c0_i32_0 = arith.constant 0 : i32
    %c0_i32_1 = arith.constant 0 : i32
    return %c0_i32, %c0_i32_0 : i32, i32
  }
  func.func @transform_6(%arg0: i32) -> (i32, i32) {
    %c0_i32 = arith.constant 0 : i32
    %c0_i32_0 = arith.constant 0 : i32
    %c0_i32_1 = arith.constant 0 : i32
    return %c0_i32, %c0_i32_0 : i32, i32
  }
  func.func @transform_7(%arg0: i32) -> (i32, i32) {
    %c0_i32 = arith.constant 0 : i32
    %c0_i32_0 = arith.constant 0 : i32
    return %arg0, %c0_i32 : i32, i32
  }
}

</mosaic_0001>

<bundles_post_ra>
// kernel: tpu_custom_call.1
= control target key start
LH: loop header
LB: loop body
LE: loop exit
PB: predicated region body
PF: predicated region fallthrough
CT: control target
= control target key end

     0   :  { %v1032_v47 = vmov 1983009808   ;;  %v170_v49 = vlaneseq  ;;  %s1517_s0 = inlined_call_operand.vmem [shape: f32[2,1024], index: 0, kind: input, shape index: {}]   ;;  %s1518_s1 = inlined_call_operand.vmem [shape: f32[1024,32], index: 1, kind: input, shape index: {}]   ;;  %s1519_s2 = inlined_call_operand.vmem [shape: f32[1,32], index: 2, kind: input, shape index: {}]   ;;  %s1520_s3 = inlined_call_operand.vmem [shape: f32[32,16], index: 3, kind: input, shape index: {}]   ;;  %s1521_s4 = inlined_call_operand.vmem [shape: f32[1,16], index: 4, kind: input, shape index: {}]   ;;  %s1522_s5 = inlined_call_operand.vmem [shape: f32[16,128], index: 5, kind: input, shape index: {}]   ;;  %s1523_s6 = inlined_call_operand.vmem [shape: f32[1,128], index: 6, kind: input, shape index: {}]   ;;  %s1524_s7 = inlined_call_operand.hbm [shape: f32[2,128], index: 7, kind: output, shape index: {}]  }
   0x1   :  { %v45_v0 = vld [vmem:[%s1518_s1 + $0x80] sm:$0xff]  ;;  %v46_v1 = vld [vmem:[%s1518_s1 + $0x88] sm:$0xff]  ;;  %v47_v11 = vld [vmem:[%s1518_s1 + $0x90] sm:$0xff]  ;;  %v168_v48 = vunpack.c.l.s4 %v1032_v47 }
   0x2   :  { %v29_v2 = vld [vmem:[%s1518_s1] sm:$0xff]  ;;  %v860_v3 = vpack.c.bf16 %v46_v1, %v45_v0  ;;  %v30_v4 = vld [vmem:[%s1518_s1 + $0x8] sm:$0xff]  ;;  %v48_v13 = vld [vmem:[%s1518_s1 + $0x98] sm:$0xff]  ;;  %v171_v0 = vshrl.u32 %v170_v49, 7 }
   0x3   :  { %v77_v5 = vld [vmem:[%s1518_s1 + $0x180] sm:$0xff]  ;;  %v78_v6 = vld [vmem:[%s1518_s1 + $0x188] sm:$0xff]  ;;  %v862_v7 = vpack.c.bf16 %v30_v4, %v29_v2  ;;  %v31_v14 = vld [vmem:[%s1518_s1 + $0x10] sm:$0xff]  ;;  %v864_v16 = vpack.c.bf16 %v48_v13, %v47_v11  ;;  %v169_v63 = vunpack.c.0.s8 %v168_v48 }
   0x4   :  { %v892_v8 = vpack.c.bf16 %v78_v6, %v77_v5  ;;  %v61_v9 = vld [vmem:[%s1518_s1 + $0x100] sm:$0xff]  ;;  %v62_v10 = vld [vmem:[%s1518_s1 + $0x108] sm:$0xff]  ;;  %861 = vmatprep.subr.bf16.mxu0 %v860_v3  ;;  %v32_v15 = vld [vmem:[%s1518_s1 + $0x18] sm:$0xff] }
   0x5   :  { %v894_v12 = vpack.c.bf16 %v62_v10, %v61_v9  ;;  %863 = vmatpush3.bf16.msra.mxu0 %v862_v7  ;;  %v866_v17 = vpack.c.bf16 %v32_v15, %v31_v14  ;;  %v79_v18 = vld [vmem:[%s1518_s1 + $0x190] sm:$0xff]  ;;  %v80_v19 = vld [vmem:[%s1518_s1 + $0x198] sm:$0xff]  ;;  %v49_v23 = vld [vmem:[%s1518_s1 + $0xa0] sm:$0xff]  ;;  %v1227_v13 = vsub.s32 %v169_v63, %v171_v0 }
   0x6   :  { %893 = vmatprep.subr.bf16.mxu1 %v892_v8  ;;  %v63_v20 = vld [vmem:[%s1518_s1 + $0x110] sm:$0xff]  ;;  %v896_v21 = vpack.c.bf16 %v80_v19, %v79_v18  ;;  %v64_v22 = vld [vmem:[%s1518_s1 + $0x118] sm:$0xff]  ;;  %v50_v24 = vld [vmem:[%s1518_s1 + $0xa8] sm:$0xff]  ;;  %865 = vmatprep.subr.bf16.mxu0 %v864_v16 }
   0x7   :  { %895 = vmatpush3.bf16.msra.mxu1 %v894_v12  ;;  %v898_v25 = vpack.c.bf16 %v64_v22, %v63_v20  ;;  %v868_v26 = vpack.c.bf16 %v50_v24, %v49_v23  ;;  %v33_v27 = vld [vmem:[%s1518_s1 + $0x20] sm:$0xff]  ;;  %v34_v28 = vld [vmem:[%s1518_s1 + $0x28] sm:$0xff]  ;;  %v51_v35 = vld [vmem:[%s1518_s1 + $0xb0] sm:$0xff] }
   0x8   :  { %v81_v29 = vld [vmem:[%s1518_s1 + $0x1a0] sm:$0xff]  ;;  %897 = vmatprep.subr.bf16.mxu1 %v896_v21  ;;  %v82_v30 = vld [vmem:[%s1518_s1 + $0x1a8] sm:$0xff]  ;;  %v870_v33 = vpack.c.bf16 %v34_v28, %v33_v27  ;;  %v52_v36 = vld [vmem:[%s1518_s1 + $0xb8] sm:$0xff] }
   0x9   :  { %v65_v31 = vld [vmem:[%s1518_s1 + $0x120] sm:$0xff]  ;;  %v66_v32 = vld [vmem:[%s1518_s1 + $0x128] sm:$0xff]  ;;  %867 = vmatpush3.bf16.msra.mxu0 %v866_v17  ;;  %v900_v34 = vpack.c.bf16 %v82_v30, %v81_v29  ;;  %v35_v37 = vld [vmem:[%s1518_s1 + $0x30] sm:$0xff]  ;;  %v872_v39 = vpack.c.bf16 %v52_v36, %v51_v35 }
   0xa   :  { %869 = vmatprep.subr.bf16.mxu0 %v868_v26  ;;  %v902_v38 = vpack.c.bf16 %v66_v32, %v65_v31  ;;  %v36_v40 = vld [vmem:[%s1518_s1 + $0x38] sm:$0xff]  ;;  %v83_v41 = vld [vmem:[%s1518_s1 + $0x1b0] sm:$0xff]  ;;  %v53_v46 = vld [vmem:[%s1518_s1 + $0xc0] sm:$0xff] }
   0xb   :  { %899 = vmatpush3.bf16.msra.mxu1 %v898_v25  ;;  %v84_v42 = vld [vmem:[%s1518_s1 + $0x1b8] sm:$0xff]  ;;  %v67_v44 = vld [vmem:[%s1518_s1 + $0x130] sm:$0xff]  ;;  %v54_v50 = vld [vmem:[%s1518_s1 + $0xc8] sm:$0xff]  ;;  %v874_v51 = vpack.c.bf16 %v36_v40, %v35_v37 }
   0xc   :  { %901 = vmatprep.subr.bf16.mxu1 %v900_v34  ;;  %v904_v43 = vpack.c.bf16 %v84_v42, %v83_v41  ;;  %v68_v45 = vld [vmem:[%s1518_s1 + $0x138] sm:$0xff]  ;;  %v85_v52 = vld [vmem:[%s1518_s1 + $0x1c0] sm:$0xff]  ;;  %v86_v53 = vld [vmem:[%s1518_s1 + $0x1c8] sm:$0xff]  ;;  %v876_v55 = vpack.c.bf16 %v54_v50, %v53_v46 }
   0xd   :  { %871 = vmatpush3.bf16.msra.mxu0 %v870_v33  ;;  %v906_v54 = vpack.c.bf16 %v68_v45, %v67_v44  ;;  %v37_v56 = vld [vmem:[%s1518_s1 + $0x40] sm:$0xff]  ;;  %v38_v57 = vld [vmem:[%s1518_s1 + $0x48] sm:$0xff]  ;;  %v908_v59 = vpack.c.bf16 %v86_v53, %v85_v52  ;;  %v55_v61 = vld [vmem:[%s1518_s1 + $0xd0] sm:$0xff] }
   0xe   :  { %873 = vmatprep.subr.bf16.mxu0 %v872_v39  ;;  %v69_v58 = vld [vmem:[%s1518_s1 + $0x140] sm:$0xff]  ;;  %v70_v60 = vld [vmem:[%s1518_s1 + $0x148] sm:$0xff]  ;;  %v56_v62 = vld [vmem:[%s1518_s1 + $0xd8] sm:$0xff]  ;;  %v878_v3 = vpack.c.bf16 %v38_v57, %v37_v56 }
   0xf   :  { %903 = vmatpush3.bf16.msra.mxu1 %v902_v38  ;;  %v87_v1 = vld [vmem:[%s1518_s1 + $0x1d0] sm:$0xff]  ;;  %v88_v2 = vld [vmem:[%s1518_s1 + $0x1d8] sm:$0xff]  ;;  %v910_v4 = vpack.c.bf16 %v70_v60, %v69_v58  ;;  %v880_v5 = vpack.c.bf16 %v56_v62, %v55_v61  ;;  %v57_v11 = vld [vmem:[%s1518_s1 + $0xe0] sm:$0xff] }
  0x10   :  { %905 = vmatprep.subr.bf16.mxu1 %v904_v43  ;;  %v39_v6 = vld [vmem:[%s1518_s1 + $0x50] sm:$0xff]  ;;  %v40_v7 = vld [vmem:[%s1518_s1 + $0x58] sm:$0xff]  ;;  %v912_v9 = vpack.c.bf16 %v88_v2, %v87_v1  ;;  %v58_v12 = vld [vmem:[%s1518_s1 + $0xe8] sm:$0xff] }
  0x11   :  { %875 = vmatpush3.bf16.msra.mxu0 %v874_v51  ;;  %v71_v8 = vld [vmem:[%s1518_s1 + $0x150] sm:$0xff]  ;;  %v72_v10 = vld [vmem:[%s1518_s1 + $0x158] sm:$0xff]  ;;  %v89_v14 = vld [vmem:[%s1518_s1 + $0x1e0] sm:$0xff]  ;;  %v882_v16 = vpack.c.bf16 %v40_v7, %v39_v6  ;;  %v884_v19 = vpack.c.bf16 %v58_v12, %v57_v11 }
  0x12   :  { %877 = vmatprep.subr.bf16.mxu0 %v876_v55  ;;  %v90_v15 = vld [vmem:[%s1518_s1 + $0x1e8] sm:$0xff]  ;;  %v41_v17 = vld [vmem:[%s1518_s1 + $0x60] sm:$0xff]  ;;  %v914_v18 = vpack.c.bf16 %v72_v10, %v71_v8  ;;  %v59_v25 = vld [vmem:[%s1518_s1 + $0xf0] sm:$0xff] }
  0x13   :  { %907 = vmatpush3.bf16.msra.mxu1 %v906_v54  ;;  %v42_v20 = vld [vmem:[%s1518_s1 + $0x68] sm:$0xff]  ;;  %v73_v21 = vld [vmem:[%s1518_s1 + $0x160] sm:$0xff]  ;;  %v916_v23 = vpack.c.bf16 %v90_v15, %v89_v14  ;;  %v60_v26 = vld [vmem:[%s1518_s1 + $0xf8] sm:$0xff] }
  0x14   :  { %909 = vmatprep.subr.bf16.mxu1 %v908_v59  ;;  %v27_v22 = vld [vmem:[%s1517_s0] sm:$0xff]  ;;  %v74_v24 = vld [vmem:[%s1518_s1 + $0x168] sm:$0xff]  ;;  %v91_v29 = vld [vmem:[%s1518_s1 + $0x1f0] sm:$0xff]  ;;  %v886_v31 = vpack.c.bf16 %v42_v20, %v41_v17  ;;  %v888_v35 = vpack.c.bf16 %v60_v26, %v59_v25 }
  0x15   :  { %879 = vmatpush3.bf16.msra.mxu0 %v878_v3  ;;  %v173_v27 = vrot.slane %v27_v22, %v1227_v13  ;;  %v166_v28 = vcombine.high %v27_v22, %v27_v22  ;;  %v92_v30 = vld [vmem:[%s1518_s1 + $0x1f8] sm:$0xff]  ;;  %v918_v34 = vpack.c.bf16 %v74_v24, %v73_v21  ;;  %v43_v36 = vld [vmem:[%s1518_s1 + $0x70] sm:$0xff]  ;;  %v109_v41 = vld [vmem:[%s1518_s1 + $0x280] sm:$0xff] }
  0x16   :  { %881 = vmatprep.subr.bf16.mxu0 %v880_v5  ;;  %v44_v37 = vld [vmem:[%s1518_s1 + $0x78] sm:$0xff]  ;;  %v75_v38 = vld [vmem:[%s1518_s1 + $0x170] sm:$0xff]  ;;  %v920_v39 = vpack.c.bf16 %v92_v30, %v91_v29  ;;  %v110_v42 = vld [vmem:[%s1518_s1 + $0x288] sm:$0xff] }
  0x17   :  { %911 = vmatpush3.bf16.msra.mxu1 %v910_v4  ;;  %v181_v32 = vcombine.high %v173_v27, %v173_v27  ;;  %v180_v33 = vrot.slane %v166_v28, %v1227_v13  ;;  %v76_v40 = vld [vmem:[%s1518_s1 + $0x178] sm:$0xff]  ;;  %v141_v44 = vld [vmem:[%s1518_s1 + $0x380] sm:$0xff]  ;;  %v142_v45 = vld [vmem:[%s1518_s1 + $0x388] sm:$0xff]  ;;  %v890_v46 = vpack.c.bf16 %v44_v37, %v43_v36  ;;  %v924_v48 = vpack.c.bf16 %v110_v42, %v109_v41 }
  0x18   :  { %913 = vmatprep.subr.bf16.mxu1 %v912_v9  ;;  %v922_v47 = vpack.c.bf16 %v76_v40, %v75_v38  ;;  %v93_v49 = vld [vmem:[%s1518_s1 + $0x200] sm:$0xff]  ;;  %v94_v50 = vld [vmem:[%s1518_s1 + $0x208] sm:$0xff]  ;;  %v956_v52 = vpack.c.bf16 %v142_v45, %v141_v44  ;;  %v111_v54 = vld [vmem:[%s1518_s1 + $0x290] sm:$0xff] }
  0x19   :  { %883 = vmatpush3.bf16.msra.mxu0 %v882_v16  ;;  %272 = vmatprep.mubr.f32.mxu0 %v181_v32  ;;  %v182_v43 = vcombine.high %v180_v33, %v180_v33  ;;  %v125_v51 = vld [vmem:[%s1518_s1 + $0x300] sm:$0xff]  ;;  %v126_v53 = vld [vmem:[%s1518_s1 + $0x308] sm:$0xff]  ;;  %v112_v55 = vld [vmem:[%s1518_s1 + $0x298] sm:$0xff]  ;;  %v926_v58 = vpack.c.bf16 %v94_v50, %v93_v49 }
  0x1a   :  { %885 = vmatprep.subr.bf16.mxu0 %v884_v19  ;;  %v143_v56 = vld [vmem:[%s1518_s1 + $0x390] sm:$0xff]  ;;  %v144_v57 = vld [vmem:[%s1518_s1 + $0x398] sm:$0xff]  ;;  %v958_v59 = vpack.c.bf16 %v126_v53, %v125_v51  ;;  %v928_v60 = vpack.c.bf16 %v112_v55, %v111_v54  ;;  %v113_v2 = vld [vmem:[%s1518_s1 + $0x2a0] sm:$0xff] }
  0x1b   :  { %915 = vmatpush3.bf16.msra.mxu1 %v914_v18  ;;  %342 = vmatprep.mubr.f32.mxu1 %v182_v43  ;;  %v95_v61 = vld [vmem:[%s1518_s1 + $0x210] sm:$0xff]  ;;  %v96_v62 = vld [vmem:[%s1518_s1 + $0x218] sm:$0xff]  ;;  %v960_v0 = vpack.c.bf16 %v144_v57, %v143_v56  ;;  %v114_v3 = vld [vmem:[%s1518_s1 + $0x2a8] sm:$0xff] }
  0x1c   :  { %917 = vmatprep.subr.bf16.mxu1 %v916_v23  ;;  %v127_v63 = vld [vmem:[%s1518_s1 + $0x310] sm:$0xff]  ;;  %v128_v1 = vld [vmem:[%s1518_s1 + $0x318] sm:$0xff]  ;;  %v145_v4 = vld [vmem:[%s1518_s1 + $0x3a0] sm:$0xff]  ;;  %v930_v6 = vpack.c.bf16 %v96_v62, %v95_v61  ;;  %v932_v8 = vpack.c.bf16 %v114_v3, %v113_v2 }
  0x1d   :  { %887 = vmatpush3.bf16.msra.mxu0 %v886_v31  ;;  %v146_v5 = vld [vmem:[%s1518_s1 + $0x3a8] sm:$0xff]  ;;  %v962_v7 = vpack.c.bf16 %v128_v1, %v127_v63  ;;  %v97_v9 = vld [vmem:[%s1518_s1 + $0x220] sm:$0xff]  ;;  %v115_v15 = vld [vmem:[%s1518_s1 + $0x2b0] sm:$0xff] }
  0x1e   :  { %889 = vmatprep.subr.bf16.mxu0 %v888_v35  ;;  %v98_v10 = vld [vmem:[%s1518_s1 + $0x228] sm:$0xff]  ;;  %v129_v11 = vld [vmem:[%s1518_s1 + $0x320] sm:$0xff]  ;;  %v964_v12 = vpack.c.bf16 %v146_v5, %v145_v4  ;;  %v116_v16 = vld [vmem:[%s1518_s1 + $0x2b8] sm:$0xff] }
  0x1f   :  { %919 = vmatpush3.bf16.msra.mxu1 %v918_v34  ;;  %v130_v14 = vld [vmem:[%s1518_s1 + $0x328] sm:$0xff]  ;;  %v147_v17 = vld [vmem:[%s1518_s1 + $0x3b0] sm:$0xff]  ;;  %v148_v18 = vld [vmem:[%s1518_s1 + $0x3b8] sm:$0xff]  ;;  %v934_v19 = vpack.c.bf16 %v98_v10, %v97_v9  ;;  %v936_v22 = vpack.c.bf16 %v116_v16, %v115_v15 }
  0x20   :  { %921 = vmatprep.subr.bf16.mxu1 %v920_v39  ;;  %v99_v20 = vld [vmem:[%s1518_s1 + $0x230] sm:$0xff]  ;;  %v966_v21 = vpack.c.bf16 %v130_v14, %v129_v11  ;;  %v100_v23 = vld [vmem:[%s1518_s1 + $0x238] sm:$0xff]  ;;  %v968_v26 = vpack.c.bf16 %v148_v18, %v147_v17  ;;  %v118_v28 = vld [vmem:[%s1518_s1 + $0x2c8] sm:$0xff] }
  0x21   :  { %891 = vmatpush3.bf16.msra.mxu0 %v890_v46  ;;  %v131_v24 = vld [vmem:[%s1518_s1 + $0x330] sm:$0xff]  ;;  %v132_v25 = vld [vmem:[%s1518_s1 + $0x338] sm:$0xff]  ;;  %v149_v29 = vld [vmem:[%s1518_s1 + $0x3c0] sm:$0xff] }
  0x22   :  { %925 = vmatprep.subr.bf16.mxu0 %v924_v48  ;;  %v150_v30 = vld [vmem:[%s1518_s1 + $0x3c8] sm:$0xff] }
  0x23   :  { %923 = vmatpush3.bf16.msra.mxu1 %v922_v47  ;;  %v28_v31 = vld [vmem:[%s1517_s0 + $0x8] sm:$0xff] }
  0x24   :  { %957 = vmatprep.subr.bf16.mxu1 %v956_v52  ;;  %273 = vmatmul.mubr.f32.vlgmr.msra.gmra.mrb[0].mxu0 %v173_v27  ;;  %v117_v27 = vld [vmem:[%s1518_s1 + $0x2c0] sm:$0xff] }
  0x25   :  { %927 = vmatpush3.bf16.msra.mxu0 %v926_v58 }
  0x26   :  { %343 = vmatmul.mubr.f32.vlgmr.msra.gmra.mrb[0].mxu1 %v180_v33  ;;  %929 = vmatprep.subr.bf16.mxu0 %v928_v60 }
  0x27   :  { %959 = vmatpush3.bf16.msra.mxu1 %v958_v59 }
  0x28   :  { %961 = vmatprep.subr.bf16.mxu1 %v960_v0 }
  0x29   :  { %931 = vmatpush3.bf16.msra.mxu0 %v930_v6 }
  0x2a   :  { %933 = vmatprep.subr.bf16.mxu0 %v932_v8 }
  0x2b   :  { %963 = vmatpush3.bf16.msra.mxu1 %v962_v7 }
  0x2c   :  { %965 = vmatprep.subr.bf16.mxu1 %v964_v12 }
  0x2d   :  { %12 = vsyncpa [#allocation3], 0  ;;  %935 = vmatpush3.bf16.msra.mxu0 %v934_v19  ;;  %v938_v32 = vpack.c.bf16 %v100_v23, %v99_v20  ;;  %v1388_v33 = vrot.slane %v28_v31, %v1227_v13  ;;  %v183_v34 = vcombine.high %v28_v31, %v28_v31  ;;  %v970_v35 = vpack.c.bf16 %v132_v25, %v131_v24  ;;  %v101_v37 = vld [vmem:[%s1518_s1 + $0x240] sm:$0xff]  ;;  %v102_v38 = vld [vmem:[%s1518_s1 + $0x248] sm:$0xff] }
  0x2e   :  { %937 = vmatprep.subr.bf16.mxu0 %v936_v22  ;;  %v940_v36 = vpack.c.bf16 %v118_v28, %v117_v27  ;;  %v133_v39 = vld [vmem:[%s1518_s1 + $0x340] sm:$0xff]  ;;  %v972_v40 = vpack.c.bf16 %v150_v30, %v149_v29  ;;  %v134_v41 = vld [vmem:[%s1518_s1 + $0x348] sm:$0xff]  ;;  %v119_v42 = vld [vmem:[%s1518_s1 + $0x2d0] sm:$0xff]  ;;  %v942_v48 = vpack.c.bf16 %v102_v38, %v101_v37  ;;  %v1033_v22 = vmov 0.0|0.0  }
  0x2f   :  { %967 = vmatpush3.bf16.msra.mxu1 %v966_v21  ;;  %v120_v43 = vld [vmem:[%s1518_s1 + $0x2d8] sm:$0xff]  ;;  %v198_v44 = vcombine.high %v1388_v33, %v1388_v33  ;;  %v197_v45 = vrot.slane %v183_v34, %v1227_v13  ;;  %v151_v46 = vld [vmem:[%s1518_s1 + $0x3d0] sm:$0xff]  ;;  %v974_v50 = vpack.c.bf16 %v134_v41, %v133_v39  ;;  %v121_v56 = vld [vmem:[%s1518_s1 + $0x2e0] sm:$0xff]  ;;  %vm1034_vm0 = vmmov 0  }
  0x30   :  { %969 = vmatprep.subr.bf16.mxu1 %v968_v26  ;;  %v152_v47 = vld [vmem:[%s1518_s1 + $0x3d8] sm:$0xff]  ;;  %v944_v51 = vpack.c.bf16 %v120_v43, %v119_v42  ;;  %v103_v13 = vld [vmem:[%s1518_s1 + $0x250] sm:$0xff]  ;;  %v122_v57 = vld [vmem:[%s1518_s1 + $0x2e8] sm:$0xff]  ;;  %v1035_v25 = vmov 0.0   ;;  %vm508_vm1 = vcmask 261120   ;;  %vm600_vm2 = vcmask 130048  }
  0x31   :  { %939 = vmatpush3.bf16.msra.mxu0 %v938_v32  ;;  %412 = vmatprep.mubr.f32.mxu0 %v198_v44  ;;  %v199_v49 = vcombine.high %v197_v45, %v197_v45  ;;  %v104_v52 = vld [vmem:[%s1518_s1 + $0x258] sm:$0xff]  ;;  %v135_v53 = vld [vmem:[%s1518_s1 + $0x350] sm:$0xff]  ;;  %v976_v54 = vpack.c.bf16 %v152_v47, %v151_v46  ;;  %v153_v58 = vld [vmem:[%s1518_s1 + $0x3e0] sm:$0xff]  ;;  %v948_v62 = vpack.c.bf16 %v122_v57, %v121_v56 }
  0x32   :  { %941 = vmatprep.subr.bf16.mxu0 %v940_v36  ;;  %v136_v55 = vld [vmem:[%s1518_s1 + $0x358] sm:$0xff]  ;;  %v154_v59 = vld [vmem:[%s1518_s1 + $0x3e8] sm:$0xff]  ;;  %v946_v60 = vpack.c.bf16 %v104_v52, %v103_v13  ;;  %v105_v63 = vld [vmem:[%s1518_s1 + $0x260] sm:$0xff] }
  0x33   :  { %971 = vmatpush3.bf16.msra.mxu1 %v970_v35  ;;  %482 = vmatprep.mubr.f32.mxu1 %v199_v49  ;;  %v978_v61 = vpack.c.bf16 %v136_v55, %v135_v53  ;;  %v106_v0 = vld [vmem:[%s1518_s1 + $0x268] sm:$0xff]  ;;  %v137_v1 = vld [vmem:[%s1518_s1 + $0x360] sm:$0xff]  ;;  %v980_v2 = vpack.c.bf16 %v154_v59, %v153_v58  ;;  %v123_v4 = vld [vmem:[%s1518_s1 + $0x2f0] sm:$0xff] }
  0x34   :  { %973 = vmatprep.subr.bf16.mxu1 %v972_v40  ;;  %v138_v3 = vld [vmem:[%s1518_s1 + $0x368] sm:$0xff]  ;;  %v124_v5 = vld [vmem:[%s1518_s1 + $0x2f8] sm:$0xff]  ;;  %v155_v6 = vld [vmem:[%s1518_s1 + $0x3f0] sm:$0xff]  ;;  %v950_v8 = vpack.c.bf16 %v106_v0, %v105_v63 }
  0x35   :  { %943 = vmatpush3.bf16.msra.mxu0 %v942_v48  ;;  %v156_v7 = vld [vmem:[%s1518_s1 + $0x3f8] sm:$0xff]  ;;  %v982_v9 = vpack.c.bf16 %v138_v3, %v137_v1  ;;  %v952_v10 = vpack.c.bf16 %v124_v5, %v123_v4  ;;  %v107_v11 = vld [vmem:[%s1518_s1 + $0x270] sm:$0xff]  ;;  %v497_v19 = vld [vmem:[%s1520_s3] sm:$0xff] }
  0x36   :  { %945 = vmatprep.subr.bf16.mxu0 %v944_v51  ;;  %v108_v12 = vld [vmem:[%s1518_s1 + $0x278] sm:$0xff]  ;;  %v984_v14 = vpack.c.bf16 %v156_v7, %v155_v6  ;;  %v139_v15 = vld [vmem:[%s1518_s1 + $0x370] sm:$0xff]  ;;  %v498_v20 = vld [vmem:[%s1520_s3 + $0x8] sm:$0xff] }
  0x37   :  { %975 = vmatpush3.bf16.msra.mxu1 %v974_v50  ;;  %v140_v16 = vld [vmem:[%s1518_s1 + $0x378] sm:$0xff]  ;;  %v954_v17 = vpack.c.bf16 %v108_v12, %v107_v11  ;;  %v499_v21 = vld [vmem:[%s1520_s3 + $0x10] sm:$0xff]  ;;  %v989_v23 = vpack.c.bf16 %v498_v20, %v497_v19  ;;  %v689_v28 = vld [vmem:[%s1519_s2] ss:$0 sm:$0xff] }
  0x38   :  { %977 = vmatprep.subr.bf16.mxu1 %v976_v54  ;;  %v986_v18 = vpack.c.bf16 %v140_v16, %v139_v15  ;;  %v500_v24 = vld [vmem:[%s1520_s3 + $0x18] sm:$0xff]  ;;  %v591_v52 = vld [vmem:[%s1522_s5] sm:$0xff]  ;;  %v592_v53 = vld [vmem:[%s1522_s5 + $0x8] sm:$0xff] }
  0x39   :  { %947 = vmatpush3.bf16.msra.mxu0 %v946_v60  ;;  %v992_v26 = vpack.c.bf16 %v500_v24, %v499_v21  ;;  %v995_v54 = vpack.c.bf16 %v592_v53, %v591_v52  ;;  %v690_v55 = vld [vmem:[%s1521_s4] ss:$0 sm:$0xff]  ;;  %s1036_s4 = smov [#allocation2]  }
  0x3a   :  { %949 = vmatprep.subr.bf16.mxu0 %v948_v62  ;;  %v692_v4 = vld [vmem:[%s1523_s6] ss:$0 sm:$0xff]  ;;  %s681_s19 = sshll.u32 %s1036_s4, 4  ;;  %s682_s19 = int_to_ptr.vmem [resolvable:$true] %s681_s19 }
  0x3b   :  { %979 = vmatpush3.bf16.msra.mxu1 %v978_v61  ;;  %s1008_s20 = scalar_lea.vmem %s682_s19, 32  ;;  %p1013_p1 = scmp.lt.s32.totalorder %s682_s19, %s682_s19 }
  0x3c   :  { %981 = vmatprep.subr.bf16.mxu1 %v980_v2  ;;  %p1009_p0 = scmp.ne.s32.totalorder %s682_s19, %s1008_s20  ;;  %p1014_p2 = scmp.lt.s32.totalorder %s1008_s20, %s1008_s20 }
  0x3d   :  { %951 = vmatpush3.bf16.msra.mxu0 %v950_v8 }
  0x3e   :  { %953 = vmatprep.subr.bf16.mxu0 %v952_v10  ;;  %p1015_p3 = por %p1014_p2, %p1013_p1 }
  0x3f   :  { %983 = vmatpush3.bf16.msra.mxu1 %v982_v9 }
  0x40   :  { %985 = vmatprep.subr.bf16.mxu1 %v984_v14  ;;  %p1016_p4 = pnand %p1015_p3, %p1009_p0 }
  0x41   :  { %955 = vmatpush3.bf16.msra.mxu0 %v954_v17 }
  0x42   :  { %988 = vmatprep.subr.bf16.mxu0 %v1033_v22 }
  0x43   :  { %987 = vmatpush3.bf16.msra.mxu1 %v986_v18 }
  0x44   :  { %413 = vmatmul.mubr.f32.vlgmr.msra.gmra.mrb[2].mxu0 %v1388_v33  ;;  %994 = vmatprep.subr.bf16.mxu1 %v1033_v22 }
  0x45   :  { %850 = vmatprep.mubr.msk.f32.mxu0 %vm1034_vm0, %v1035_v25  ;;  %990 = vmatpush3.bf16.msra.mxu0 %v989_v23 }
  0x46   :  { %483 = vmatmul.mubr.f32.vlgmr.msra.gmra.mrb[2].mxu1 %v197_v45  ;;  %991 = vmatprep.subr.bf16.mxu0 %v1033_v22 }
  0x47   :  { %857 = vmatprep.mubr.msk.f32.mxu1 %vm1034_vm0, %v1035_v25  ;;  %996 = vmatpush3.bf16.msra.mxu1 %v995_v54 }
  0x49   :  { %993 = vmatpush3.bf16.msra.mxu0 %v992_v26 }
  0xf7   :  { %v726_v27 = vpop.f32.mrb[0].mxu0 }
  0xf8   :  { %v727_v29 = vpop.f32.mrb[1].mxu0 }
  0xf9   :  { %v761_v30 = vpop.f32.mrb[0].mxu1  ;;  %v728_v31 = vadd.f32 %v727_v29, %v726_v27 }
  0xfa   :  { %v762_v32 = vpop.f32.mrb[1].mxu1 }
  0xfb   :  { %v763_v33 = vadd.f32 %v762_v32, %v761_v30  ;;  %v275_v34 = vadd.f32 %v728_v31, %v689_v28 }
  0xfd   :  { %v345_v35 = vadd.f32 %v763_v33, %v275_v34 }
 0x117   :  { %v796_v36 = vpop.f32.mrb[2].mxu0 }
 0x118   :  { %v797_v37 = vpop.f32.mrb[3].mxu0 }
 0x119   :  { %v831_v38 = vpop.f32.mrb[2].mxu1  ;;  %v798_v39 = vadd.f32 %v797_v37, %v796_v36 }
 0x11a   :  { %v832_v40 = vpop.f32.mrb[3].mxu1 }
 0x11b   :  { %v833_v41 = vadd.f32 %v832_v40, %v831_v38  ;;  %v415_v42 = vadd.f32 %v798_v39, %v345_v35 }
 0x11d   :  { %v485_v43 = vadd.f32 %v833_v41, %v415_v42 }
 0x11f   :  { %v489_v44 = vmul.f32 0.044715, %v485_v43  ;;  %v488_v50 = vmul.f32 0.5, %v485_v43 }
 0x121   :  { %v490_v45 = vmul.f32 %v489_v44, %v485_v43 }
 0x123   :  { %v491_v46 = vmul.f32 %v490_v45, %v485_v43 }
 0x125   :  { %v492_v47 = vadd.f32 %v491_v46, %v485_v43 }
 0x127   :  { %v493_v48 = vmul.f32 0.7978846, %v492_v47 }
 0x129   :  { %1004 = vtanh.f32 %v493_v48 }
 0x133   :  { %v1005_v49 = vpop.eup %1004 }
 0x134   :  { %v495_v51 = vadd.f32 1.0, %v1005_v49 }
 0x136   :  { %v496_v13 = vmul.f32 %v495_v51, %v488_v50 }
 0x138   :  { %851 = vmatmul.mubr.msk.f32.vlgmr.msra.gmra.mrb[4].mxu0 %vm508_vm1, %v496_v13 }
 0x20b   :  { %v578_v56 = vpop.f32.mrb[4].mxu0 }
 0x20c   :  { %v579_v57 = vadd.f32 %v690_v55, %v578_v56  ;;  %v852_v58 = vpop.f32.mrb[5].mxu0 }
 0x20e   :  { %v583_v59 = vmul.f32 0.044715, %v579_v57  ;;  %v582_v1 = vmul.f32 0.5, %v579_v57 }
 0x210   :  { %v584_v60 = vmul.f32 %v583_v59, %v579_v57 }
 0x212   :  { %v585_v61 = vmul.f32 %v584_v60, %v579_v57 }
 0x214   :  { %v586_v62 = vadd.f32 %v585_v61, %v579_v57 }
 0x216   :  { %v587_v63 = vmul.f32 0.7978846, %v586_v62 }
 0x218   :  { %1006 = vtanh.f32 %v587_v63 }
 0x222   :  { %v1007_v0 = vpop.eup %1006 }
 0x223   :  { %v589_v2 = vadd.f32 1.0, %v1007_v0 }
 0x225   :  { %v590_v3 = vmul.f32 %v589_v2, %v582_v1 }
 0x227   :  { %858 = vmatmul.mubr.msk.f32.vlgmr.msra.gmra.mrb[4].mxu1 %vm600_vm2, %v590_v3 }
 0x2fa   :  { %v670_v5 = vpop.f32.mrb[4].mxu1 }
 0x2fb   :  { %v671_v6 = vadd.f32 %v692_v4, %v670_v5  ;;  %v859_v7 = vpop.f32.mrb[5].mxu1 }
 0x2fd   :  { %674 = vst [vmem:[#allocation2] sm:$0x3] %v671_v6 }
 0x2fe   :  { %1019 = shalt.err (!%p1016_p4)
}
 0x2ff   :  { %s1020_s23 = scalar_lea.hbm %s1524_s7, 32 }
 0x300   :  { %p1021_p5 = scmp.ne.s32.totalorder %s1524_s7, %s1020_s23  ;;  %p1024_p6 = scmp.lt.u32.totalorder %s1020_s23, %s1524_s7 }
 0x302   :  { %p1026_p7 = pnand %p1024_p6, %p1021_p5 }
 0x304   :  { %1029 = shalt.err (!%p1026_p7)
}
 0x305   :  { %684 = dma.vmem_to_hbm [thread:$0]  %s682_s19, 32, %s1524_s7, [#allocation3]  }
 0x306   :  { %1030 = dma.done.wait [#allocation3], 32  }
 0x307   :  { %1031 = vsyncadd [#allocation3], 4294967264 }
 0x308   :  { %688 = vsyncpa [#allocation3], 1 }

</bundles_post_ra>
